<compile_context>
chip_gen: v7x
topology: tpu7x:2x2x1
jax: 0.10.0
libtpu: 0.0.40
codegen_flags: <defaults>
</compile_context>

<pallas_src>
import functools

import jax
import jax.numpy as jnp
from jax.experimental import pallas as pl
from jax.experimental.pallas import tpu as pltpu


def _cdiv(a, b):
    return -(-a // b)


def _round_up(a, b):
    return _cdiv(a, b) * b


def _f1_partial_kernel(y_pred_ref, y_true_ref, tp_ref, ps_ref, cnt_ref, *,
                       n_rows, tile_rows, tiles_per_split, needs_mask):
    """Accumulate per-class tp, colsum(softmax), and label counts for one split."""
    t = pl.program_id(1)

    @pl.when(t == 0)
    def _init():
        tp_ref[...] = jnp.zeros_like(tp_ref)
        ps_ref[...] = jnp.zeros_like(ps_ref)
        cnt_ref[...] = jnp.zeros_like(cnt_ref)

    logits = y_pred_ref[...].astype(jnp.float32)          # (TN, C)
    labels = y_true_ref[...]                              # (TN, 1) int32
    tn, c = logits.shape

    validf = None
    if needs_mask:
        s = pl.program_id(0)
        block = s * tiles_per_split + t                   # virtual (unclamped) tile id
        row = jax.lax.broadcasted_iota(jnp.int32, (tn, 1), 0)
        valid = (block * tile_rows + row) < n_rows        # (TN, 1) bool
        # Zero garbage logits of padded rows *before* exp so they cannot
        # become inf/NaN and leak into the column sums.
        logits = jnp.where(valid, logits, 0.0)
        validf = valid.astype(jnp.float32)

    # Numerically stable softmax over classes (dim=1); exact divide for parity.
    row_max = jnp.max(logits, axis=1, keepdims=True)
    exps = jnp.exp(logits - row_max)
    probs = exps / jnp.sum(exps, axis=1, keepdims=True)   # (TN, C)

    class_ids = jax.lax.broadcasted_iota(jnp.int32, (tn, c), 1)
    one_hot = (class_ids == labels).astype(jnp.float32)   # (TN, C)

    if validf is not None:
        probs = probs * validf
        one_hot = one_hot * validf

    # Per-class label counts on the otherwise-idle MXU (exact: 0/1 operands).
    ones_row = jnp.ones((1, tn), jnp.float32)
    cnt = jnp.dot(ones_row, one_hot, preferred_element_type=jnp.float32)   # (1, C)
    # tp and colsum(probs) as exact-f32 sublane reductions (1e-5 parity).
    tp = jnp.sum(one_hot * probs, axis=0, keepdims=True)                   # (1, C)
    ps = jnp.sum(probs, axis=0, keepdims=True)                             # (1, C)

    tp_ref[...] += tp.reshape(1, 1, c)
    ps_ref[...] += ps.reshape(1, 1, c)
    cnt_ref[...] += cnt.reshape(1, 1, c)


def _f1_epilogue_kernel(tp_ref, ps_ref, cnt_ref, out_ref, *, epsilon):
    """Combine per-split partials and compute 1 - mean(F1)."""
    tp = jnp.sum(tp_ref[...], axis=0)      # (1, C)
    ps = jnp.sum(ps_ref[...], axis=0)      # (1, C) = tp + fp
    cnt = jnp.sum(cnt_ref[...], axis=0)    # (1, C) = tp + fn
    fp = ps - tp
    fn = cnt - tp
    precision = tp / (tp + fp + epsilon)
    recall = tp / (tp + fn + epsilon)
    f1 = 2.0 * (precision * recall) / (precision + recall + epsilon)
    f1 = jnp.clip(f1, epsilon, 1.0 - epsilon)
    out_ref[0, 0] = 1.0 - jnp.mean(f1)


def f1_loss(y_pred, y_true, *, classes, epsilon=1e-7, tile_rows=512, num_splits=None):
    """Pallas equivalent of F1_Loss(classes, epsilon).forward(y_pred, y_true)."""
    assert y_pred.ndim == 2
    assert y_true.ndim == 1
    n, c = y_pred.shape
    assert c == classes

    y_true_2d = y_true.astype(jnp.int32).reshape(n, 1)
    itemsize = jnp.dtype(y_pred.dtype).itemsize

    # Tile rows: as large as practical (>=512 rows approaches HBM roofline)
    # while keeping the f32 working set small enough for v7x's 64 MiB VMEM.
    tile_rows = max(8, (int(tile_rows) // 8) * 8)
    max_rows = max(8, ((512 * 1024) // max(1, c)) // 8 * 8)   # ~2 MiB f32 per tile
    tn = min(tile_rows, max_rows, _round_up(n, 8))

    num_tiles = _cdiv(n, tn)
    if num_splits is None:
        # Two independent partial reductions -> both TensorCores on v7x.
        num_splits = 2 if num_tiles >= 2 else 1
    num_splits = max(1, min(int(num_splits), num_tiles))
    tiles_per_split = _cdiv(num_tiles, num_splits)

    needs_clamp = num_splits * tiles_per_split != num_tiles
    needs_mask = num_splits * tiles_per_split * tn != n

    if needs_clamp:
        def row_block(s, t):
            # Phantom tiles of an uneven split re-read the last real block;
            # their rows are fully masked inside the kernel.
            return jnp.minimum(s * tiles_per_split + t, num_tiles - 1)
    else:
        def row_block(s, t):
            return s * tiles_per_split + t

    # Explicit VMEM budget: double-buffered input tiles + f32 temporaries.
    tile_f32_bytes = tn * c * 4
    est = 2 * (tn * c * itemsize + tn * 4) + 8 * tile_f32_bytes + 6 * c * 4 + (2 << 20)
    vmem_limit = int(min(max(est, 16 << 20), 48 << 20))

    kern = functools.partial(
        _f1_partial_kernel,
        n_rows=n, tile_rows=tn, tiles_per_split=tiles_per_split,
        needs_mask=needs_mask)

    part = jax.ShapeDtypeStruct((num_splits, 1, c), jnp.float32)
    part_spec = pl.BlockSpec((1, 1, c), lambda s, t: (s, 0, 0))

    tp_p, ps_p, cnt_p = pl.pallas_call(
        kern,
        out_shape=(part, part, part),
        grid=(num_splits, tiles_per_split),
        in_specs=[
            pl.BlockSpec((tn, c), lambda s, t: (row_block(s, t), 0)),
            pl.BlockSpec((tn, 1), lambda s, t: (row_block(s, t), 0)),
        ],
        out_specs=(part_spec, part_spec, part_spec),
        compiler_params=pltpu.CompilerParams(
            dimension_semantics=("parallel", "arbitrary"),
            vmem_limit_bytes=vmem_limit),
    )(y_pred, y_true_2d)

    out = pl.pallas_call(
        functools.partial(_f1_epilogue_kernel, epsilon=float(epsilon)),
        out_shape=jax.ShapeDtypeStruct((1, 1), jnp.float32),
        in_specs=[pl.BlockSpec(memory_space=pltpu.VMEM)] * 3,
        out_specs=pl.BlockSpec(memory_space=pltpu.SMEM),
    )(tp_p, ps_p, cnt_p)
    return out[0, 0]


def _f1_loss_ref(y_pred, y_true, *, classes, epsilon=1e-7):
    """Pure-JAX reference mirroring the PyTorch module."""
    y_true_oh = jax.nn.one_hot(y_true, classes, dtype=jnp.float32)
    p = jax.nn.softmax(y_pred.astype(jnp.float32), axis=1)
    tp = jnp.sum(y_true_oh * p, axis=0)
    fp = jnp.sum((1.0 - y_true_oh) * p, axis=0)
    fn = jnp.sum(y_true_oh * (1.0 - p), axis=0)
    precision = tp / (tp + fp + epsilon)
    recall = tp / (tp + fn + epsilon)
    f1 = 2.0 * (precision * recall) / (precision + recall + epsilon)
    f1 = jnp.clip(f1, epsilon, 1.0 - epsilon)
    return 1.0 - jnp.mean(f1)


if __name__ == "__main__":
    base_key = jax.random.PRNGKey(0)

    def _run_case(n, c, tile_rows, tol=1e-5):
        k1, k2 = jax.random.split(jax.random.fold_in(base_key, n * 131 + c))
        y_pred = jax.random.normal(k1, (n, c), dtype=jnp.float32)
        y_true = jax.random.randint(k2, (n,), 0, c, dtype=jnp.int32)
        loss = jax.block_until_ready(
            f1_loss(y_pred, y_true, classes=c, epsilon=1e-7, tile_rows=tile_rows))
        ref = jax.block_until_ready(
            _f1_loss_ref(y_pred, y_true, classes=c, epsilon=1e-7))
        assert jnp.allclose(loss, ref, atol=tol, rtol=tol), (n, c, float(loss), float(ref))

    # Single-tile case (the module's canonical small shape).
    _run_case(8, 32, tile_rows=512)
    # Multi-tile, two parallel splits, even decomposition (pipelined path).
    _run_case(64, 32, tile_rows=16)
    # Ragged batch: clamped phantom tile + masked padded tail.
    _run_case(44, 32, tile_rows=16)

    print("KERNEL_OK")
</pallas_src>

<mosaic_0001>
module attributes {stable_mosaic.version = 11 : i64} {
  func.func @_f1_partial_kernel(%arg0: i32, %arg1: i32, %arg2: memref<8x32xf32, #tpu.memory_space<vmem>>, %arg3: memref<8x1xi32, #tpu.memory_space<vmem>>, %arg4: memref<1x1x32xf32, #tpu.memory_space<vmem>>, %arg5: memref<1x1x32xf32, #tpu.memory_space<vmem>>, %arg6: memref<1x1x32xf32, #tpu.memory_space<vmem>>) attributes {dimension_semantics = [#tpu.dimension_semantics<parallel>, #tpu.dimension_semantics<arbitrary>], iteration_bounds = array<i64: 1, 1>, scalar_prefetch = 0 : i64, scratch_operands = 0 : i64, tpu.core_type = #tpu.core_type<tc>, window_params = [{transform_indices = @transform_0, window_bounds = array<i64: 8, 32>}, {transform_indices = @transform_1, window_bounds = array<i64: 8, 1>}, {transform_indices = @transform_2, window_bounds = array<i64: 1, 1, 32>}, {transform_indices = @transform_3, window_bounds = array<i64: 1, 1, 32>}, {transform_indices = @transform_4, window_bounds = array<i64: 1, 1, 32>}]} {
    %c0_i32 = arith.constant 0 : i32
    %0 = arith.cmpi eq, %arg1, %c0_i32 : i32
    %1 = arith.extui %0 : i1 to i32
    %c0_i32_0 = arith.constant 0 : i32
    %2 = arith.cmpi ne, %1, %c0_i32_0 : i32
    scf.if %2 {
      %cst_27 = arith.constant 0.000000e+00 : f32
      %38 = vector.broadcast %cst_27 : f32 to vector<1x1x32xf32>
      %c0_28 = arith.constant 0 : index
      %c0_29 = arith.constant 0 : index
      %c0_30 = arith.constant 0 : index
      %39 = vector.load %arg4[%c0_28, %c0_29, %c0_30] : memref<1x1x32xf32, #tpu.memory_space<vmem>>, vector<1x1x32xf32>
      tpu.vector_store %arg4[%c0_28, %c0_29, %c0_30], %38 {strides = array<i32>} : memref<1x1x32xf32, #tpu.memory_space<vmem>>, vector<1x1x32xf32>,
      %cst_31 = arith.constant 0.000000e+00 : f32
      %40 = vector.broadcast %cst_31 : f32 to vector<1x1x32xf32>
      %c0_32 = arith.constant 0 : index
      %c0_33 = arith.constant 0 : index
      %c0_34 = arith.constant 0 : index
      %41 = vector.load %arg5[%c0_32, %c0_33, %c0_34] : memref<1x1x32xf32, #tpu.memory_space<vmem>>, vector<1x1x32xf32>
      tpu.vector_store %arg5[%c0_32, %c0_33, %c0_34], %40 {strides = array<i32>} : memref<1x1x32xf32, #tpu.memory_space<vmem>>, vector<1x1x32xf32>,
      %cst_35 = arith.constant 0.000000e+00 : f32
      %42 = vector.broadcast %cst_35 : f32 to vector<1x1x32xf32>
      %c0_36 = arith.constant 0 : index
      %c0_37 = arith.constant 0 : index
      %c0_38 = arith.constant 0 : index
      %43 = vector.load %arg6[%c0_36, %c0_37, %c0_38] : memref<1x1x32xf32, #tpu.memory_space<vmem>>, vector<1x1x32xf32>
      tpu.vector_store %arg6[%c0_36, %c0_37, %c0_38], %42 {strides = array<i32>} : memref<1x1x32xf32, #tpu.memory_space<vmem>>, vector<1x1x32xf32>,
    } else {
    }
    %c0 = arith.constant 0 : index
    %c0_1 = arith.constant 0 : index
    %3 = vector.load %arg2[%c0, %c0_1] : memref<8x32xf32, #tpu.memory_space<vmem>>, vector<8x32xf32>
    %c0_2 = arith.constant 0 : index
    %c0_3 = arith.constant 0 : index
    %4 = vector.load %arg3[%c0_2, %c0_3] : memref<8x1xi32, #tpu.memory_space<vmem>>, vector<8x1xi32>
    %cst = arith.constant dense<0xFF800000> : vector<8xf32>
    %5 = vector.multi_reduction <maximumf>, %3, %cst [1] : vector<8x32xf32> to vector<8xf32>
    %6 = vector.shape_cast %5 : vector<8xf32> to vector<8x1xf32>
    %7 = vector.broadcast %6 : vector<8x1xf32> to vector<8x32xf32>
    %8 = arith.subf %3, %7 : vector<8x32xf32>
    %9 = math.exp %8 : vector<8x32xf32>
    %cst_4 = arith.constant dense<0.000000e+00> : vector<8xf32>
    %10 = vector.multi_reduction <add>, %9, %cst_4 [1] : vector<8x32xf32> to vector<8xf32>
    %11 = vector.shape_cast %10 : vector<8xf32> to vector<8x1xf32>
    %12 = vector.broadcast %11 : vector<8x1xf32> to vector<8x32xf32>
    %13 = arith.divf %9, %12 : vector<8x32xf32>
    %14 = tpu.iota {dimensions = array<i32: 1>} : vector<8x32xi32>
    %15 = vector.broadcast %4 : vector<8x1xi32> to vector<8x32xi32>
    %16 = arith.cmpi eq, %14, %15 : vector<8x32xi32>
    %17 = arith.extui %16 : vector<8x32xi1> to vector<8x32xi32>
    %18 = arith.sitofp %17 : vector<8x32xi32> to vector<8x32xf32>
    %cst_5 = arith.constant 1.000000e+00 : f32
    %19 = vector.broadcast %cst_5 : f32 to vector<1x8xf32>
    %cst_6 = arith.constant dense<0.000000e+00> : vector<1x32xf32>
    %20 = tpu.matmul %19, %18, %cst_6 {dimension_numbers = #tpu.dot_dimension_numbers<[1], [0], [0], [1], [0, 0, 1, 1], [], []>} : vector<1x8xf32>, vector<8x32xf32>, vector<1x32xf32> -> vector<1x32xf32>
    %21 = arith.mulf %18, %13 : vector<8x32xf32>
    %cst_7 = arith.constant dense<0.000000e+00> : vector<32xf32>
    %22 = vector.multi_reduction <add>, %21, %cst_7 [0] : vector<8x32xf32> to vector<32xf32>
    %23 = vector.shape_cast %22 : vector<32xf32> to vector<1x32xf32>
    %cst_8 = arith.constant dense<0.000000e+00> : vector<32xf32>
    %24 = vector.multi_reduction <add>, %13, %cst_8 [0] : vector<8x32xf32> to vector<32xf32>
    %25 = vector.shape_cast %24 : vector<32xf32> to vector<1x32xf32>
    %c0_9 = arith.constant 0 : index
    %c0_10 = arith.constant 0 : index
    %c0_11 = arith.constant 0 : index
    %26 = vector.load %arg4[%c0_9, %c0_10, %c0_11] : memref<1x1x32xf32, #tpu.memory_space<vmem>>, vector<1x1x32xf32>
    %27 = vector.shape_cast %23 : vector<1x32xf32> to vector<1x1x32xf32>
    %28 = arith.addf %26, %27 : vector<1x1x32xf32>
    %c0_12 = arith.constant 0 : index
    %c0_13 = arith.constant 0 : index
    %c0_14 = arith.constant 0 : index
    %29 = vector.load %arg4[%c0_12, %c0_13, %c0_14] : memref<1x1x32xf32, #tpu.memory_space<vmem>>, vector<1x1x32xf32>
    tpu.vector_store %arg4[%c0_12, %c0_13, %c0_14], %28 {strides = array<i32>} : memref<1x1x32xf32, #tpu.memory_space<vmem>>, vector<1x1x32xf32>,
    %c0_15 = arith.constant 0 : index
    %c0_16 = arith.constant 0 : index
    %c0_17 = arith.constant 0 : index
    %30 = vector.load %arg5[%c0_15, %c0_16, %c0_17] : memref<1x1x32xf32, #tpu.memory_space<vmem>>, vector<1x1x32xf32>
    %31 = vector.shape_cast %25 : vector<1x32xf32> to vector<1x1x32xf32>
    %32 = arith.addf %30, %31 : vector<1x1x32xf32>
    %c0_18 = arith.constant 0 : index
    %c0_19 = arith.constant 0 : index
    %c0_20 = arith.constant 0 : index
    %33 = vector.load %arg5[%c0_18, %c0_19, %c0_20] : memref<1x1x32xf32, #tpu.memory_space<vmem>>, vector<1x1x32xf32>
    tpu.vector_store %arg5[%c0_18, %c0_19, %c0_20], %32 {strides = array<i32>} : memref<1x1x32xf32, #tpu.memory_space<vmem>>, vector<1x1x32xf32>,
    %c0_21 = arith.constant 0 : index
    %c0_22 = arith.constant 0 : index
    %c0_23 = arith.constant 0 : index
    %34 = vector.load %arg6[%c0_21, %c0_22, %c0_23] : memref<1x1x32xf32, #tpu.memory_space<vmem>>, vector<1x1x32xf32>
    %35 = vector.shape_cast %20 : vector<1x32xf32> to vector<1x1x32xf32>
    %36 = arith.addf %34, %35 : vector<1x1x32xf32>
    %c0_24 = arith.constant 0 : index
    %c0_25 = arith.constant 0 : index
    %c0_26 = arith.constant 0 : index
    %37 = vector.load %arg6[%c0_24, %c0_25, %c0_26] : memref<1x1x32xf32, #tpu.memory_space<vmem>>, vector<1x1x32xf32>
    tpu.vector_store %arg6[%c0_24, %c0_25, %c0_26], %36 {strides = array<i32>} : memref<1x1x32xf32, #tpu.memory_space<vmem>>, vector<1x1x32xf32>,
    return
  }
  func.func @transform_0(%arg0: i32, %arg1: i32) -> (i32, i32) {
    %c1_i32 = arith.constant 1 : i32
    %0 = arith.muli %arg0, %c1_i32 : i32
    %1 = arith.addi %0, %arg1 : i32
    %c0_i32 = arith.constant 0 : i32
    %c0_i32_0 = arith.constant 0 : i32
    return %1, %c0_i32 : i32, i32
  }
  func.func @transform_1(%arg0: i32, %arg1: i32) -> (i32, i32) {
    %c1_i32 = arith.constant 1 : i32
    %0 = arith.muli %arg0, %c1_i32 : i32
    %1 = arith.addi %0, %arg1 : i32
    %c0_i32 = arith.constant 0 : i32
    %c0_i32_0 = arith.constant 0 : i32
    return %1, %c0_i32 : i32, i32
  }
  func.func @transform_2(%arg0: i32, %arg1: i32) -> (i32, i32, i32) {
    %c0_i32 = arith.constant 0 : i32
    %c0_i32_0 = arith.constant 0 : i32
    %c0_i32_1 = arith.constant 0 : i32
    return %arg0, %c0_i32, %c0_i32_0 : i32, i32, i32
  }
  func.func @transform_3(%arg0: i32, %arg1: i32) -> (i32, i32, i32) {
    %c0_i32 = arith.constant 0 : i32
    %c0_i32_0 = arith.constant 0 : i32
    %c0_i32_1 = arith.constant 0 : i32
    return %arg0, %c0_i32, %c0_i32_0 : i32, i32, i32
  }
  func.func @transform_4(%arg0: i32, %arg1: i32) -> (i32, i32, i32) {
    %c0_i32 = arith.constant 0 : i32
    %c0_i32_0 = arith.constant 0 : i32
    %c0_i32_1 = arith.constant 0 : i32
    return %arg0, %c0_i32, %c0_i32_0 : i32, i32, i32
  }
}

</mosaic_0001>

<bundles_post_ra>
// kernel: tpu_custom_call.1
= control target key start
LH: loop header
LB: loop body
LE: loop exit
PB: predicated region body
PF: predicated region fallthrough
CT: control target
= control target key end

     0   :  { %10 = vsyncpa [#allocation3], 0  ;;  %s426_s0 = inlined_call_operand.vmem [shape: f32[8,32], index: 0, kind: input, shape index: {}]   ;;  %s427_s1 = inlined_call_operand.vmem [shape: s32[8,1], index: 1, kind: input, shape index: {}]   ;;  %s428_s2 = inlined_call_operand.hbm [shape: f32[1,1,32], index: 2, kind: output, shape index: {0}]   ;;  %s429_s3 = inlined_call_operand.hbm [shape: f32[1,1,32], index: 3, kind: output, shape index: {1}]   ;;  %s430_s4 = inlined_call_operand.hbm [shape: f32[1,1,32], index: 4, kind: output, shape index: {2}]  }
   0x1   :  { %v59_v0 = vld [vmem:[%s427_s1] sm:$0xff] }
   0x2   :  { %11 = vsyncpa [#allocation5], 0  ;;  %v324_v1 = vmov 0   ;;  %v325_v2 = vmov 0.0   ;;  %vm326_vm0 = vmmov 0   ;;  %v58_v3 = vld [vmem:[%s426_s0] sm:$0xff]  ;;  %v72_v5 = vlaneseq }
   0x3   :  { %249 = vset.pattern.permute.xlu0 %v324_v1  ;;  %237 = vmatprep.subr.mxu0 %v325_v2  ;;  %vm60_vm1 = vcmask 261120   ;;  %vm80_vm2 = vcmask 64512   ;;  %v327_v8 = vmov 1.0   ;;  %vm54_vm4 = vcmask 253952   ;;  %s328_s0 = smov [#allocation4]   ;;  %s329_s19 = smov [#allocation6]  }
   0x4   :  { %75 = vperm.xlu0 %249, %v59_v0   ;;  %239 = vmatprep.mubr.msk.f32.mxu0 %vm326_vm0, %v325_v2  ;;  %v61_v4 = vsel %vm60_vm1, %v58_v3, -inf  ;;  %v73_v6 = vand.u32 127, %v72_v5  ;;  %57 = vst.msk [vmem:[#allocation6] sm:$0x1] %vm54_vm4, %v325_v2  ;;  %55 = vst.msk [vmem:[#allocation2] sm:$0x1] %vm54_vm4, %v325_v2 }
   0x5   :  { %56 = vst.msk [vmem:[#allocation4] sm:$0x1] %vm54_vm4, %v325_v2  ;;  %s195_s1 = sshll.u32 %s328_s0, 4  ;;  %s205_s20 = sshll.u32 %s329_s19, 4  ;;  %s196_s1 = int_to_ptr.vmem [resolvable:$true] %s195_s1  ;;  %s372_s20 = int_to_ptr.vmem [resolvable:$true] %s205_s20 }
   0x6   :  { %s330_s21 = smov [#allocation2]   ;;  %s254_s23 = scalar_lea.vmem %s196_s1, 16 }
   0x7   :  { %s185_s22 = sshll.u32 %s330_s21, 4  ;;  %p255_p0 = scmp.ne.s32.totalorder %s196_s1, %s254_s23  ;;  %s375_s22 = int_to_ptr.vmem [resolvable:$true] %s185_s22 }
   0x8   :  { %s258_s24 = scalar_lea.vmem %s196_s1, 32  ;;  %p259_p1 = scmp.lt.s32.totalorder %s196_s1, %s196_s1 }
   0x9   :  { %p260_p2 = scmp.lt.s32.totalorder %s258_s24, %s254_s23 }
   0xb   :  { %v176_v15 = vld [vmem:[#allocation6] sm:$0x1]  ;;  %v169_v37 = vld [vmem:[#allocation2] sm:$0x1]  ;;  %p261_p3 = por %p260_p2, %p259_p1 }
   0xc   :  { %v173_v34 = vld [vmem:[#allocation4] sm:$0x1] }
   0xd   :  { %p262_p4 = pnand %p261_p3, %p255_p0 }
  0x23   :  { %62 = vmax.xlane.f32.xlu0 %v61_v4 }
  0x83   :  { %v76_v7 = vpop.permute.xlu0 %75 }
  0x84   :  { %vm77_vm3 = vcmp.eq.s32.totalorder %v73_v6, %v76_v7 }
  0x85   :  { %238 = vmatpush3.msk.msra.mxu0 %vm77_vm3, %v327_v8  ;;  %v232_v21 = vsel %vm77_vm3, 1.0, %v325_v2 }
  0x86   :  { %240 = vmatmul.mubr.msk.f32.vlgmr.msra.gmra.mrb[0].mxu0 %vm80_vm2, %v327_v8 }
  0xb0   :  { %v63_v9 = vpop.xlane.xlu0 %62 }
  0xb1   :  { %v64_v10 = vsub.f32 %v58_v3, %v63_v9 }
  0xb3   :  { %v65_v11 = vmul.f32 1.442695, %v64_v10 }
  0xb5   :  { %250 = vpow2.f32 %v65_v11 }
  0xbf   :  { %v251_v12 = vpop.eup %250 }
  0xc0   :  { %v67_v13 = vsel %vm60_vm1, %v251_v12, 0.0 }
  0xc1   :  { %68 = vadd.xlane.f32.xlu1 %v67_v13 }
 0x14e   :  { %v69_v14 = vpop.xlane.xlu1 %68 }
 0x14f   :  { %252 = vrcp.f32 %v69_v14 }
 0x159   :  { %v253_v16 = vpop.eup %252  ;;  %v150_v17 = vpop.f32.mrb[0].mxu0 }
 0x15a   :  { %v71_v18 = vmul.f32 %v253_v16, %v251_v12  ;;  %v177_v19 = vadd.f32 %v176_v15, %v150_v17  ;;  %v241_v20 = vpop.f32.mrb[1].mxu0 }
 0x15c   :  { %v154_v22 = vmul.f32 %v232_v21, %v71_v18  ;;  %v162_v23 = vsel %vm60_vm1, %v71_v18, 0.0  ;;  %178 = vst.msk [vmem:[#allocation6] sm:$0x1] %vm54_vm4, %v177_v19 }
 0x15d   :  { %v163_v24 = vrot.slane %v162_v23, 4 }
 0x15e   :  { %v155_v25 = vsel %vm60_vm1, %v154_v22, 0.0 }
 0x15f   :  { %v164_v26 = vadd.f32 %v163_v24, %v162_v23  ;;  %v156_v27 = vrot.slane %v155_v25, 4 }
 0x161   :  { %v165_v28 = vrot.slane %v164_v26, 2  ;;  %v157_v29 = vadd.f32 %v156_v27, %v155_v25 }
 0x163   :  { %v166_v30 = vadd.f32 %v165_v28, %v164_v26  ;;  %v158_v31 = vrot.slane %v157_v29, 2 }
 0x165   :  { %v167_v32 = vrot.slane %v166_v30, 1  ;;  %v159_v33 = vadd.f32 %v158_v31, %v157_v29 }
 0x167   :  { %v168_v35 = vadd.f32 %v167_v32, %v166_v30  ;;  %v160_v36 = vrot.slane %v159_v33, 1 }
 0x169   :  { %v174_v38 = vadd.f32 %v173_v34, %v168_v35  ;;  %v161_v39 = vadd.f32 %v160_v36, %v159_v33 }
 0x16b   :  { %175 = vst.msk [vmem:[#allocation4] sm:$0x1] %vm54_vm4, %v174_v38  ;;  %v170_v40 = vadd.f32 %v169_v37, %v161_v39 }
 0x16c   :  { %265 = shalt.err (!%p262_p4)
}
 0x16d   :  { %s266_s27 = scalar_lea.hbm %s429_s3, 16 }
 0x16e   :  { %p267_p5 = scmp.ne.s32.totalorder %s429_s3, %s266_s27  ;;  %p270_p6 = scmp.lt.u32.totalorder %s266_s27, %s429_s3 }
 0x170   :  { %p272_p7 = pnand %p270_p6, %p267_p5 }
 0x172   :  { %275 = shalt.err (!%p272_p7)
}
 0x173   :  { %198 = dma.vmem_to_hbm [thread:$0]  %s196_s1, 16, %s429_s3, [#allocation5]   ;;  %172 = vst.msk [vmem:[#allocation2] sm:$0x1] %vm54_vm4, %v170_v40 }
 0x174   :  { %s276_s8 = scalar_lea.vmem %s372_s20, 16  ;;  %s280_s9 = scalar_lea.vmem %s372_s20, 32 }
 0x175   :  { %p277_p8 = scmp.ne.s32.totalorder %s372_s20, %s276_s8  ;;  %p281_p9 = scmp.lt.s32.totalorder %s372_s20, %s372_s20 }
 0x176   :  { %p282_p10 = scmp.lt.s32.totalorder %s280_s9, %s276_s8 }
 0x178   :  { %p283_p11 = por %p282_p10, %p281_p9 }
 0x17a   :  { %p284_p12 = pnand %p283_p11, %p277_p8 }
 0x17c   :  { %287 = shalt.err (!%p284_p12)
}
 0x17d   :  { %s288_s12 = scalar_lea.hbm %s430_s4, 16 }
 0x17e   :  { %p289_p13 = scmp.ne.s32.totalorder %s430_s4, %s288_s12  ;;  %p292_p0 = scmp.lt.u32.totalorder %s288_s12, %s430_s4 }
 0x180   :  { %p294_p1 = pnand %p292_p0, %p289_p13 }
 0x182   :  { %297 = shalt.err (!%p294_p1)
}
 0x183   :  { %208 = dma.vmem_to_hbm [thread:$0]  %s372_s20, 16, %s430_s4, [#allocation5]  }
 0x184   :  { %s298_s18 = scalar_lea.vmem %s375_s22, 16  ;;  %s302_s0 = scalar_lea.vmem %s375_s22, 32 }
 0x185   :  { %p299_p2 = scmp.ne.s32.totalorder %s375_s22, %s298_s18  ;;  %p303_p3 = scmp.lt.s32.totalorder %s375_s22, %s375_s22 }
 0x186   :  { %p304_p4 = scmp.lt.s32.totalorder %s302_s0, %s298_s18 }
 0x188   :  { %p305_p5 = por %p304_p4, %p303_p3 }
 0x18a   :  { %p306_p6 = pnand %p305_p5, %p299_p2 }
 0x18c   :  { %309 = shalt.err (!%p306_p6)
}
 0x18d   :  { %s310_s21 = scalar_lea.hbm %s428_s2, 16 }
 0x18e   :  { %p311_p7 = scmp.ne.s32.totalorder %s428_s2, %s310_s21  ;;  %p314_p8 = scmp.lt.u32.totalorder %s310_s21, %s428_s2 }
 0x190   :  { %p316_p9 = pnand %p314_p8, %p311_p7 }
 0x192   :  { %319 = shalt.err (!%p316_p9)
}
 0x193   :  { %188 = dma.vmem_to_hbm [thread:$0]  %s375_s22, 16, %s428_s2, [#allocation3]  }
 0x194   :  { %320 = dma.done.wait [#allocation3], 16  }
 0x195   :  { %321 = vsyncadd [#allocation3], 4294967280 }
 0x196   :  { %322 = dma.done.wait [#allocation5], 32  }
 0x197   :  { %323 = vsyncadd [#allocation5], 4294967264 }
 0x198   :  { %218 = vsyncpa [#allocation3], 1 }
 0x199   :  { %219 = vsyncpa [#allocation5], 1 }

</bundles_post_ra>
